<compile_context>
chip_gen: v5e
topology: v5e:2x2
jax: 0.10.0
libtpu: 0.0.40
codegen_flags: <defaults>
</compile_context>

<pallas_src>
import jax
import jax.numpy as jnp
import numpy as np
from jax.experimental import pallas as pl
from jax.experimental.pallas import tpu as pltpu


def _pool_grouped_kernel(x_ref, pw_ref, o_ref):
    # x_ref: (R, G*2*W) -- G (even | odd) input-row pairs per kernel row.
    # pw_ref: (G*2*W, G*Wh) block-diagonal 0.25 pool matrix; the MXU does the
    # H-add, the W compaction and the averaging with f32 accumulation.
    o_ref[...] = jnp.dot(
        x_ref[...], pw_ref[...], preferred_element_type=jnp.float32
    ).astype(o_ref.dtype)


def _pool_split_kernel(x_ref, pw_ref, o_ref):
    # x_ref: (R, 2*W) -- lanes [0:W) = even input row, [W:2W) = odd input row.
    w = x_ref.shape[-1] // 2
    tmp = x_ref[:, :w].astype(jnp.float32) + x_ref[:, w:].astype(jnp.float32)
    o_ref[...] = jnp.dot(
        tmp, pw_ref[...], preferred_element_type=jnp.float32
    ).astype(o_ref.dtype)


def _round_down(x, m):
    return (x // m) * m


def downsample_avgpool2x2(x):
    """AvgPool2d(kernel=2, stride=2) on an NCHW tensor via a Pallas TPU kernel."""
    N, C, H, W = x.shape
    assert H % 2 == 0 and W % 2 == 0, "AvgPool2d(2, 2) expects even H and W"
    assert jnp.issubdtype(x.dtype, jnp.floating), (
        "DownSample Pallas kernel supports floating dtypes only")
    Hh, Wh = H // 2, W // 2
    rows = N * C * Hh                       # one row per pooled output row
    itemsize = jnp.dtype(x.dtype).itemsize

    # ---- generation-aware VMEM budget --------------------------------------
    try:
        vmem_cap = int(pltpu.get_tpu_info().vmem_capacity_bytes)
    except Exception:  # API unavailable -> conservative (v7x-sized) default
        vmem_cap = 64 * 1024 * 1024
    # ~1/10 of VMEM of input per step: double-buffered in + out (+ f32 temps)
    # stays well under the limit on v7x (64 MiB VMEM) while amortizing the
    # ~0.35 us per-step overhead on the 1.4-3.2 TB/s chips.
    tile_in_bytes = max(2 * 1024 * 1024, min(12 * 1024 * 1024, vmem_cap // 10))
    vmem_limit = min(_round_down(vmem_cap * 3 // 4, 1024), 64 * 1024 * 1024)

    # ---- lane-density grouping ----------------------------------------------
    # Fold G pooled rows per kernel row so both input (G*2W lanes) and output
    # (G*Wh lanes) blocks are lane-dense; cap K = G*2W at 256 so the MXU work
    # stays hidden behind the HBM DMA on every generation.
    g_max = max(1, 256 // (2 * W))
    G = 1
    for d in range(2, min(g_max, rows) + 1):
        if rows % d == 0:
            G = d

    if G > 1:
        grows = rows // G
        k_in = G * 2 * W                     # input block lane width
        k_mm = k_in                          # matmul K
        n_out = G * Wh                       # output block lane width
        kernel = _pool_grouped_kernel
        # output col g*Wh + j <- 0.25 * lanes {g*2W+2j, g*2W+2j+1,
        #                                      g*2W+W+2j, g*2W+W+2j+1}
        pw_np = np.zeros((k_mm, n_out), dtype=np.float32)
        g_idx = np.repeat(np.arange(G), Wh)
        j_idx = np.tile(np.arange(Wh), G)
        cols = np.arange(n_out)
        for off in (0, 1, W, W + 1):
            pw_np[g_idx * 2 * W + 2 * j_idx + off, cols] = 0.25
        pw = jnp.asarray(pw_np, dtype=x.dtype)   # 0.25 exact in f32/bf16/f16
    else:
        grows = rows
        k_in = 2 * W
        k_mm = W
        n_out = Wh
        kernel = _pool_split_kernel
        pw_np = np.zeros((k_mm, n_out), dtype=np.float32)
        cols = np.arange(Wh)
        pw_np[2 * cols, cols] = 0.25
        pw_np[2 * cols + 1, cols] = 0.25
        pw = jnp.asarray(pw_np, dtype=jnp.float32)  # LHS is cast to f32 in-kernel

    x2 = x.reshape(grows, k_in)              # free: identical row-major layout

    # ---- row tiling: cdiv grid over rows only -------------------------------
    row_bytes = k_in * itemsize
    if grows <= 8:
        R = grows                             # single tile == full dim
    else:
        r_budget = max(8, _round_down(tile_in_bytes // row_bytes, 8))
        # keep >= ~8 grid steps so v7x's two TensorCores (and the DMA pipeline)
        # always have work, while still amortizing per-step overhead.
        r_steps = max(8, _round_down(grows // 8, 8))
        R = min(r_budget, r_steps)
    grid = (pl.cdiv(grows, R),)

    bytes_accessed = (grows * k_in + grows * n_out) * itemsize \
        + int(pw.size) * jnp.dtype(pw.dtype).itemsize
    flops = 2 * grows * k_mm * n_out + (grows * W if G == 1 else 0)

    out2 = pl.pallas_call(
        kernel,
        out_shape=jax.ShapeDtypeStruct((grows, n_out), x.dtype),
        grid_spec=pltpu.PrefetchScalarGridSpec(
            num_scalar_prefetch=0,
            grid=grid,
            in_specs=[
                pl.BlockSpec((R, k_in), lambda i: (i, 0)),
                pl.BlockSpec((k_mm, n_out), lambda i: (0, 0)),
            ],
            out_specs=pl.BlockSpec((R, n_out), lambda i: (i, 0)),
        ),
        compiler_params=pltpu.CompilerParams(
            dimension_semantics=("parallel",),
            vmem_limit_bytes=vmem_limit,
        ),
        cost_estimate=pl.CostEstimate(
            flops=int(flops), transcendentals=0,
            bytes_accessed=int(bytes_accessed)),
    )(x2, pw)

    # Free reshape back to NCHW.
    return out2.reshape(N, C, Hh, Wh)


class DownSample:
    """JAX/Pallas port of the PyTorch DownSample module (AvgPool2d(2, 2))."""

    def __init__(self, channels: int, use_conv: bool = False):
        # The reference module ignores both args and has no learned params.
        del channels, use_conv

    def __call__(self, x, *args, **kwargs):
        return downsample_avgpool2x2(x)


if __name__ == "__main__":
    key = jax.random.PRNGKey(0)
    # NCHW, matching the PyTorch convention: batch=2, channels=4, spatial=16.
    x = jax.random.normal(key, (2, 4, 16, 16), dtype=jnp.float32)

    model = DownSample(channels=4)
    y = model(x)
    jax.block_until_ready(y)

    # Pure-JAX reference for AvgPool2d(2, 2).
    ref = x.reshape(2, 4, 8, 2, 8, 2).mean(axis=(3, 5))
    assert y.shape == (2, 4, 8, 8), y.shape
    assert jnp.allclose(y, ref, atol=1e-3, rtol=1e-3), "mismatch vs reference"

    print("KERNEL_OK")
</pallas_src>

<mosaic_0001>
module attributes {stable_mosaic.version = 11 : i64} {
  func.func @_pool_grouped_kernel(%arg0: i32, %arg1: memref<8x256xf32, #tpu.memory_space<vmem>>, %arg2: memref<256x64xf32, #tpu.memory_space<vmem>>, %arg3: memref<8x64xf32, #tpu.memory_space<vmem>>) attributes {dimension_semantics = [#tpu.dimension_semantics<parallel>], iteration_bounds = array<i64: 1>, scalar_prefetch = 0 : i64, scratch_operands = 0 : i64, tpu.core_type = #tpu.core_type<tc>, window_params = [{transform_indices = @transform_0, window_bounds = array<i64: 8, 256>}, {pipeline_mode = #tpu.pipeline_mode<synchronous>, transform_indices = @transform_1, window_bounds = array<i64: 256, 64>}, {transform_indices = @transform_2, window_bounds = array<i64: 8, 64>}]} {
    %c0 = arith.constant 0 : index
    %c0_0 = arith.constant 0 : index
    %0 = vector.load %arg1[%c0, %c0_0] : memref<8x256xf32, #tpu.memory_space<vmem>>, vector<8x256xf32>
    %c0_1 = arith.constant 0 : index
    %c0_2 = arith.constant 0 : index
    %1 = vector.load %arg2[%c0_1, %c0_2] : memref<256x64xf32, #tpu.memory_space<vmem>>, vector<256x64xf32>
    %cst = arith.constant dense<0.000000e+00> : vector<8x64xf32>
    %2 = tpu.matmul %0, %1, %cst {dimension_numbers = #tpu.dot_dimension_numbers<[1], [0], [0], [1], [0, 0, 1, 1], [], []>} : vector<8x256xf32>, vector<256x64xf32>, vector<8x64xf32> -> vector<8x64xf32>
    %c0_3 = arith.constant 0 : index
    %c0_4 = arith.constant 0 : index
    %3 = vector.load %arg3[%c0_3, %c0_4] : memref<8x64xf32, #tpu.memory_space<vmem>>, vector<8x64xf32>
    tpu.vector_store %arg3[%c0_3, %c0_4], %2 {strides = array<i32>} : memref<8x64xf32, #tpu.memory_space<vmem>>, vector<8x64xf32>,
    return
  }
  func.func @transform_0(%arg0: i32) -> (i32, i32) {
    %c0_i32 = arith.constant 0 : i32
    %c0_i32_0 = arith.constant 0 : i32
    return %arg0, %c0_i32 : i32, i32
  }
  func.func @transform_1(%arg0: i32) -> (i32, i32) {
    %c0_i32 = arith.constant 0 : i32
    %c0_i32_0 = arith.constant 0 : i32
    %c0_i32_1 = arith.constant 0 : i32
    return %c0_i32, %c0_i32_0 : i32, i32
  }
  func.func @transform_2(%arg0: i32) -> (i32, i32) {
    %c0_i32 = arith.constant 0 : i32
    %c0_i32_0 = arith.constant 0 : i32
    return %arg0, %c0_i32 : i32, i32
  }
}

</mosaic_0001>

<bundles_post_ra>
// kernel: tpu_custom_call.1
= control target key start
LH: loop header
LB: loop body
LE: loop exit
PB: predicated region body
PF: predicated region fallthrough
CT: control target
= control target key end

     0   :  { %s252_s0 = inlined_call_operand.vmem [shape: f32[8,256], index: 0, kind: input, shape index: {}]   ;;  %s253_s1 = inlined_call_operand.vmem [shape: f32[256,64], index: 1, kind: input, shape index: {}]   ;;  %s254_s2 = inlined_call_operand.hbm [shape: f32[8,64], index: 2, kind: output, shape index: {}]  }
   0x1   :  { %v29_v0 = vld [vmem:[%s253_s1 + $0x78] sm:$0xff]  ;;  %v28_v2 = vld [vmem:[%s253_s1 + $0x70] sm:$0xff]  ;;  %v27_v4 = vld [vmem:[%s253_s1 + $0x68] sm:$0xff] }
   0x2   :  { %v45_v1 = vld [vmem:[%s253_s1 + $0xf8] sm:$0xff]  ;;  %46 = vmatpush.msra.mxu0 %v29_v0  ;;  %v44_v3 = vld [vmem:[%s253_s1 + $0xf0] sm:$0xff]  ;;  %v43_v5 = vld [vmem:[%s253_s1 + $0xe8] sm:$0xff] }
   0x3   :  { %66 = vmatpush.msra.mxu1 %v45_v1  ;;  %v26_v6 = vld [vmem:[%s253_s1 + $0x60] sm:$0xff]  ;;  %v25_v8 = vld [vmem:[%s253_s1 + $0x58] sm:$0xff]  ;;  %v24_v10 = vld [vmem:[%s253_s1 + $0x50] sm:$0xff] }
   0x4   :  { %47 = vmatpush.msra.mxu0 %v28_v2  ;;  %v42_v7 = vld [vmem:[%s253_s1 + $0xe0] sm:$0xff]  ;;  %v41_v9 = vld [vmem:[%s253_s1 + $0xd8] sm:$0xff]  ;;  %v40_v11 = vld [vmem:[%s253_s1 + $0xd0] sm:$0xff] }
   0x5   :  { %67 = vmatpush.msra.mxu1 %v44_v3  ;;  %v23_v12 = vld [vmem:[%s253_s1 + $0x48] sm:$0xff] }
   0x6   :  { %48 = vmatpush.msra.mxu0 %v27_v4  ;;  %v39_v13 = vld [vmem:[%s253_s1 + $0xc8] sm:$0xff] }
   0x7   :  { %68 = vmatpush.msra.mxu1 %v43_v5 }
   0x8   :  { %49 = vmatpush.msra.mxu0 %v26_v6 }
   0x9   :  { %69 = vmatpush.msra.mxu1 %v42_v7 }
   0xa   :  { %50 = vmatpush.msra.mxu0 %v25_v8 }
   0xb   :  { %70 = vmatpush.msra.mxu1 %v41_v9 }
   0xc   :  { %51 = vmatpush.msra.mxu0 %v24_v10 }
   0xd   :  { %71 = vmatpush.msra.mxu1 %v40_v11 }
   0xe   :  { %7 = vsyncpa [#allocation3], 0  ;;  %v22_v14 = vld [vmem:[%s253_s1 + $0x40] sm:$0xff]  ;;  %52 = vmatpush.msra.mxu0 %v23_v12  ;;  %v21_v16 = vld [vmem:[%s253_s1 + $0x38] sm:$0xff]  ;;  %s131_s21 = smov [#allocation2]   ;;  %vm86_vm0 = vcmask 523264  }
   0xf   :  { %v38_v15 = vld [vmem:[%s253_s1 + $0xc0] sm:$0xff]  ;;  %72 = vmatpush.msra.mxu1 %v39_v13  ;;  %v37_v17 = vld [vmem:[%s253_s1 + $0xb8] sm:$0xff]  ;;  %v20_v18 = vld [vmem:[%s253_s1 + $0x30] sm:$0xff]  ;;  %s93_s22 = sshll.u32 %s131_s21, 4  ;;  %s94_s22 = int_to_ptr.vmem [resolvable:$true] %s93_s22 }
  0x10   :  { %53 = vmatpush.msra.mxu0 %v22_v14  ;;  %v36_v19 = vld [vmem:[%s253_s1 + $0xb0] sm:$0xff]  ;;  %v19_v20 = vld [vmem:[%s253_s1 + $0x28] sm:$0xff]  ;;  %v18_v22 = vld [vmem:[%s253_s1 + $0x20] sm:$0xff] }
  0x11   :  { %73 = vmatpush.msra.mxu1 %v38_v15  ;;  %v35_v21 = vld [vmem:[%s253_s1 + $0xa8] sm:$0xff]  ;;  %v34_v23 = vld [vmem:[%s253_s1 + $0xa0] sm:$0xff]  ;;  %v17_v24 = vld [vmem:[%s253_s1 + $0x18] sm:$0xff] }
  0x12   :  { %54 = vmatpush.msra.mxu0 %v21_v16  ;;  %v33_v25 = vld [vmem:[%s253_s1 + $0x98] sm:$0xff]  ;;  %v16_v26 = vld [vmem:[%s253_s1 + $0x10] sm:$0xff]  ;;  %v15_v28 = vld [vmem:[%s253_s1 + $0x8] sm:$0xff] }
  0x13   :  { %74 = vmatpush.msra.mxu1 %v37_v17  ;;  %v32_v27 = vld [vmem:[%s253_s1 + $0x90] sm:$0xff]  ;;  %v31_v29 = vld [vmem:[%s253_s1 + $0x88] sm:$0xff]  ;;  %v14_v30 = vld [vmem:[%s253_s1] sm:$0xff] }
  0x14   :  { %55 = vmatpush.msra.mxu0 %v20_v18  ;;  %v30_v31 = vld [vmem:[%s253_s1 + $0x80] sm:$0xff]  ;;  %v13_v33 = vld [vmem:[%s252_s0 + $0x8] sm:$0xff]  ;;  %s95_s1 = sshll.u32 %s254_s2, 4  ;;  %s96_s1 = int_to_ptr.hbm [resolvable:$true] %s95_s1 }
  0x15   :  { %75 = vmatpush.msra.mxu1 %v36_v19  ;;  %v12_v32 = vld [vmem:[%s252_s0] sm:$0xff] }
  0x16   :  { %56 = vmatpush.msra.mxu0 %v19_v20 }
  0x17   :  { %76 = vmatpush.msra.mxu1 %v35_v21 }
  0x18   :  { %57 = vmatpush.msra.mxu0 %v18_v22 }
  0x19   :  { %77 = vmatpush.msra.mxu1 %v34_v23 }
  0x1a   :  { %58 = vmatpush.msra.mxu0 %v17_v24 }
  0x1b   :  { %78 = vmatpush.msra.mxu1 %v33_v25 }
  0x1c   :  { %59 = vmatpush.msra.mxu0 %v16_v26 }
  0x1d   :  { %79 = vmatpush.msra.mxu1 %v32_v27 }
  0x1e   :  { %60 = vmatpush.msra.mxu0 %v15_v28 }
  0x1f   :  { %80 = vmatpush.msra.mxu1 %v31_v29 }
  0x20   :  { %61 = vmatpush.msra.mxu0 %v14_v30 }
  0x21   :  { %81 = vmatpush.msra.mxu1 %v30_v31  ;;  %62 = vmatmul.f32.vlgmr.msra.gmra.mxu0 %v12_v32 }
  0x22   :  { %82 = vmatmul.f32.vlgmr.msra.gmra.mxu1 %v13_v33 }
  0x9e   :  { %v63_v34 = vpop.f32.mrf.mxu0 }
  0x9f   :  { %v83_v35 = vpop.f32.mrf.mxu1 }
  0xa0   :  { %v84_v36 = vadd.f32 %v83_v35, %v63_v34 }
  0xa2   :  { %87 = vst.msk [vmem:[#allocation2] sm:$0xff] %vm86_vm0, %v84_v36 }
  0xa3   :  { %98 = dma.vmem_to_hbm [thread:$0]  %s94_s22, 128, %s96_s1, [#allocation3]  }
  0xa4   :  { %129 = dma.done.wait [#allocation3], 128  }
  0xa5   :  { %130 = vsyncadd [#allocation3], 4294967168 }
  0xa6   :  { %103 = vsyncpa [#allocation3], 1 }

</bundles_post_ra>
